<compile_context>
chip_gen: v7x
topology: tpu7x:2x2x1
jax: 0.10.0
libtpu: 0.0.40
codegen_flags: <defaults>
</compile_context>

<pallas_src>
import numpy as np
import jax
import jax.numpy as jnp
from jax.experimental import pallas as pl
from jax.experimental.pallas import tpu as pltpu


# Activation fn + gain, matching StyleGAN's bias_act defaults.
# All of these are positively homogeneous: act(g*z) == g*act(z) for g > 0,
# which is what allows folding weight_gain/act_gain into a single post-act multiply.
_ACT_DEFS = {
    "linear": (lambda v: v, 1.0),
    "relu":   (lambda v: jnp.maximum(v, 0.0), float(np.sqrt(2.0))),
    "lrelu":  (lambda v: jnp.where(v >= 0.0, v, 0.2 * v), float(np.sqrt(2.0))),
}

# Sublane packing per MXU-feed-dtype itemsize (f32 -> 8, bf16 -> 16, int8/fp8 -> 32).
_ROW_PACK = {4: 8, 2: 16, 1: 32}


def _round_up(v, m):
    return (v + m - 1) // m * m


def _make_kernel(*, has_bias, mode, activation, out_gain):
    """mode: 'single' (one K step), 'multi_direct' (accumulate in o_ref, f32 out),
             'multi_scratch' (f32 VMEM accumulator, non-f32 out)."""
    act_fn, _ = _ACT_DEFS[activation]

    def finalize(acc, b_ref):
        # bias was pre-scaled by bias_gain/weight_gain at init;
        # out_gain = weight_gain * act_gain (activation is positively homogeneous).
        out = acc + b_ref[...] if b_ref is not None else acc
        out = act_fn(out)
        if out_gain != 1.0:
            out = out * out_gain
        return out

    def body(x_ref, w_ref, b_ref, o_ref, acc_ref):
        # x_ref: [tm, tk], w_ref: [tk, tn] (MXU-native RHS layout, no transpose).
        part = jnp.dot(x_ref[...], w_ref[...], preferred_element_type=jnp.float32)

        if mode == "single":
            o_ref[...] = finalize(part, b_ref).astype(o_ref.dtype)
            return

        k = pl.program_id(2)
        dst = o_ref if mode == "multi_direct" else acc_ref

        @pl.when(k == 0)
        def _():
            dst[...] = part          # first K step writes (no zero-init + add)

        @pl.when(k > 0)
        def _():
            dst[...] += part

        @pl.when(k == pl.num_programs(2) - 1)
        def _():
            o_ref[...] = finalize(dst[...], b_ref).astype(o_ref.dtype)

    if mode == "multi_scratch":
        if has_bias:
            def kernel(x_ref, w_ref, b_ref, o_ref, acc_ref):
                body(x_ref, w_ref, b_ref, o_ref, acc_ref)
        else:
            def kernel(x_ref, w_ref, o_ref, acc_ref):
                body(x_ref, w_ref, None, o_ref, acc_ref)
    else:
        if has_bias:
            def kernel(x_ref, w_ref, b_ref, o_ref):
                body(x_ref, w_ref, b_ref, o_ref, None)
        else:
            def kernel(x_ref, w_ref, o_ref):
                body(x_ref, w_ref, None, o_ref, None)

    return kernel


class FullyConnected:
    """Pallas fused fully-connected layer.

    Parameters (weight in PyTorch [out_features, in_features] layout) are
    transposed to [K, N], cast to the MXU feed dtype, and padded ONCE at
    construction; the per-call path only casts/pads x.
    """

    def __init__(self, weight, bias=None, *, weight_norm=True, activation="linear",
                 lr_multiplier=1.0, tm=512, tn=512, tk=1024,
                 matmul_dtype=jnp.bfloat16, weight_buffers=None):
        assert activation in _ACT_DEFS, f"unsupported activation: {activation}"
        N, K = weight.shape
        self.N, self.K = int(N), int(K)
        self.activation = activation
        self.mm_dtype = jnp.dtype(matmul_dtype)
        self.row_pack = _ROW_PACK.get(self.mm_dtype.itemsize, 8)
        self.weight_buffers = weight_buffers

        weight_gain = float(lr_multiplier) / (float(np.sqrt(K)) if weight_norm else 1.0)
        bias_gain = float(lr_multiplier)
        # Fused epilogue relies on act(g*z) == g*act(z) with g = weight_gain > 0.
        assert weight_gain > 0.0, "fused epilogue requires lr_multiplier > 0"
        act_gain = _ACT_DEFS[activation][1]
        self.out_gain = float(weight_gain * act_gain)

        # N/K-dependent tile plan fixed at init (hardware aligned, lane-dense).
        self.tm_default = tm
        self.tn = min(tn, _round_up(self.N, 128))
        self.tk = min(tk, _round_up(self.K, 128))
        self.Np = _round_up(self.N, self.tn)
        self.Kp = _round_up(self.K, self.tk)

        # --- one-time parameter prep (hoisted out of the per-call path) ---
        wt = jnp.asarray(weight).astype(self.mm_dtype).T          # [K, N]
        if (self.Kp, self.Np) != (self.K, self.N):
            wt = jnp.pad(wt, ((0, self.Kp - self.K), (0, self.Np - self.N)))
        self.w_kn = wt

        if bias is not None:
            # Fold bias_gain/weight_gain here so the kernel epilogue is just
            # act(acc + b) * out_gain (one VPU multiply on the critical path).
            b = (jnp.asarray(bias).astype(jnp.float32)
                 * (bias_gain / weight_gain)).reshape(1, self.N)
            if self.Np != self.N:
                b = jnp.pad(b, ((0, 0), (0, self.Np - self.N)))
            self.b2d = b
        else:
            self.b2d = None

    def __call__(self, x):
        M, K = x.shape
        assert K == self.K
        out_dtype = x.dtype

        tm = min(self.tm_default, _round_up(M, self.row_pack))
        tn, tk = self.tn, self.tk
        Mp = _round_up(M, tm)
        Np, Kp = self.Np, self.Kp

        # v7x megacore: guarantee >= 2 parallel grid steps when possible so both
        # TensorCores get an output tile (harmless ~0.35us extra step elsewhere).
        if (Mp // tm) * (Np // tn) == 1:
            if tn >= 256:
                tn //= 2
            elif tm >= 2 * self.row_pack and (tm // 2) % self.row_pack == 0:
                tm //= 2

        # Per-call input prep: only x is cast/padded.
        xk = x.astype(self.mm_dtype)
        if (Mp, Kp) != (M, K):
            xk = jnp.pad(xk, ((0, Mp - M), (0, Kp - K)))

        nk = Kp // tk
        has_bias = self.b2d is not None
        if nk == 1:
            mode = "single"          # no accumulator, no init/finalize branches
        elif jnp.dtype(out_dtype) == jnp.dtype(jnp.float32):
            mode = "multi_direct"    # accumulate straight into o_ref (resident over k)
        else:
            mode = "multi_scratch"   # f32 VMEM accumulator, cast on the last step

        w_spec_kwargs = {}
        if self.weight_buffers is not None and self.weight_buffers > 2 and nk > 1:
            # Optional deeper buffering on the streaming weight operand (v6e/v5e).
            w_spec_kwargs["pipeline_mode"] = pl.Buffered(self.weight_buffers)

        in_specs = [
            pl.BlockSpec((tm, tk), lambda i, j, k: (i, k)),                   # x tile
            pl.BlockSpec((tk, tn), lambda i, j, k: (k, j), **w_spec_kwargs),  # w [K,N] tile
        ]
        args = [xk, self.w_kn]
        if has_bias:
            in_specs.append(pl.BlockSpec((1, tn), lambda i, j, k: (0, j)))
            args.append(self.b2d)

        scratch = [pltpu.VMEM((tm, tn), jnp.float32)] if mode == "multi_scratch" else []

        kernel = _make_kernel(has_bias=has_bias, mode=mode,
                              activation=self.activation, out_gain=self.out_gain)

        # VMEM budget estimate: double-buffered inputs + double-buffered output
        # (+ f32 accumulator when present). Only raise the scoped limit if needed.
        mm_bytes = self.mm_dtype.itemsize
        out_bytes = jnp.dtype(out_dtype).itemsize
        est = (2 * (tm * tk + tk * tn) * mm_bytes
               + 2 * tm * tn * out_bytes
               + (tm * tn * 4 if mode == "multi_scratch" else 0)
               + 2 * tn * 4)
        vmem_limit = None
        if est > 24 * 1024 * 1024:
            # TODO(synk): v7x has only 64 MiB physical VMEM/core; keep tiles under ~48 MiB there.
            vmem_limit = min(int(est * 1.5), 96 * 1024 * 1024)

        y = pl.pallas_call(
            kernel,
            out_shape=jax.ShapeDtypeStruct((Mp, Np), out_dtype),
            grid_spec=pltpu.PrefetchScalarGridSpec(
                num_scalar_prefetch=0,
                grid=(Mp // tm, Np // tn, nk),
                in_specs=in_specs,
                out_specs=pl.BlockSpec((tm, tn), lambda i, j, k: (i, j)),
                scratch_shapes=scratch,
            ),
            compiler_params=pltpu.CompilerParams(
                dimension_semantics=("parallel", "parallel", "arbitrary"),
                vmem_limit_bytes=vmem_limit,
            ),
        )(*args)

        if (Mp, Np) != (M, self.N):
            y = y[:M, :self.N]
        return y


def fully_connected(x, weight, bias=None, **kwargs):
    """One-off functional form. For repeated calls, construct FullyConnected once
    so the weight transpose/cast/pad is not re-run per call."""
    return FullyConnected(weight, bias, **kwargs)(x)


def _reference(x, weight, bias, *, weight_norm=True, activation="linear",
               lr_multiplier=1.0, mm_dtype=None):
    """NumPy float64 reference; optionally models the MXU feed dtype rounding."""
    def feed(a):
        a = jnp.asarray(a)
        if mm_dtype is not None:
            a = a.astype(mm_dtype).astype(jnp.float32)
        return np.asarray(a, dtype=np.float64)

    K = weight.shape[1]
    wg = lr_multiplier / (np.sqrt(K) if weight_norm else 1.0)
    y = feed(x) @ (feed(weight) * wg).T
    if bias is not None:
        y = y + np.asarray(bias, np.float64) * lr_multiplier
    if activation == "relu":
        y = np.maximum(y, 0.0) * np.sqrt(2.0)
    elif activation == "lrelu":
        y = np.where(y >= 0.0, y, 0.2 * y) * np.sqrt(2.0)
    return y.astype(np.float32)


if __name__ == "__main__":
    key = jax.random.PRNGKey(0)
    k1, k2, k3, k4, k5 = jax.random.split(key, 5)

    # Config 1: shipped module defaults — bias=True, weight_norm=True, 'linear'.
    # Default bf16 MXU feed; reference models the bf16 input rounding exactly.
    M, K, N = 8, 256, 32
    x = jax.random.normal(k1, (M, K), dtype=jnp.float32)
    w = jax.random.normal(k2, (N, K), dtype=jnp.float32)
    b = jnp.zeros((N,), jnp.float32)
    layer = FullyConnected(w, b, weight_norm=True, activation="linear", lr_multiplier=1.0)
    y = jax.block_until_ready(layer(x))
    y_ref = _reference(x, w, b, weight_norm=True, activation="linear",
                       lr_multiplier=1.0, mm_dtype=jnp.bfloat16)
    np.testing.assert_allclose(np.asarray(y), y_ref, rtol=5e-4, atol=5e-4)

    # Config 1b: explicit f32 MXU feed (non-default path); loose tolerance since
    # default-precision f32 matmul may round through bf16 on some generations.
    layer32 = FullyConnected(w, b, matmul_dtype=jnp.float32)
    y32 = jax.block_until_ready(layer32(x))
    y32_ref = _reference(x, w, b)
    np.testing.assert_allclose(np.asarray(y32), y32_ref, rtol=2e-2, atol=2e-2)

    # Config 2: lrelu + nonzero bias + lr_multiplier != 1 (mapping-network style).
    lr2 = 0.01
    w2 = jax.random.normal(k3, (N, K), dtype=jnp.float32) / lr2
    b2 = jnp.full((N,), np.float32(1.0))
    layer2 = FullyConnected(w2, b2, weight_norm=True, activation="lrelu", lr_multiplier=lr2)
    y2 = jax.block_until_ready(layer2(x))
    y2_ref = _reference(x, w2, b2, weight_norm=True, activation="lrelu",
                        lr_multiplier=lr2, mm_dtype=jnp.bfloat16)
    np.testing.assert_allclose(np.asarray(y2), y2_ref, rtol=5e-4, atol=5e-4)

    # Config 3: multi-K accumulate-directly-into-o_ref path (f32 out), no bias, relu.
    M3, K3, N3 = 16, 1024, 64
    x3 = jax.random.normal(k4, (M3, K3), dtype=jnp.float32)
    w3 = jax.random.normal(k5, (N3, K3), dtype=jnp.float32)
    layer3 = FullyConnected(w3, None, weight_norm=False, activation="relu",
                            lr_multiplier=1.0, tk=256)   # force 4 K steps
    y3 = jax.block_until_ready(layer3(x3))
    y3_ref = _reference(x3, w3, None, weight_norm=False, activation="relu",
                        lr_multiplier=1.0, mm_dtype=jnp.bfloat16)
    np.testing.assert_allclose(np.asarray(y3), y3_ref, rtol=1e-3, atol=1e-3)

    # Config 4: bf16 activations/output -> multi-K path with f32 scratch accumulator.
    M4, K4, N4 = 16, 512, 128
    x4 = jax.random.normal(k1, (M4, K4), dtype=jnp.bfloat16)
    w4 = jax.random.normal(k2, (N4, K4), dtype=jnp.float32)
    b4 = jnp.full((N4,), np.float32(0.5))
    layer4 = FullyConnected(w4, b4, weight_norm=True, activation="lrelu",
                            lr_multiplier=1.0, tk=256)   # 2 K steps
    y4 = jax.block_until_ready(layer4(x4))
    assert y4.dtype == jnp.bfloat16
    y4_ref = _reference(x4.astype(jnp.float32), w4, b4, weight_norm=True,
                        activation="lrelu", lr_multiplier=1.0, mm_dtype=jnp.bfloat16)
    np.testing.assert_allclose(np.asarray(y4).astype(np.float32), y4_ref,
                               rtol=2e-2, atol=2e-2)

    print("KERNEL_OK")
</pallas_src>

<mosaic_0001>
module attributes {stable_mosaic.version = 11 : i64} {
  func.func @kernel(%arg0: i32, %arg1: i32, %arg2: i32, %arg3: memref<16x256xbf16, #tpu.memory_space<vmem>>, %arg4: memref<256x128xbf16, #tpu.memory_space<vmem>>, %arg5: memref<1x128xf32, #tpu.memory_space<vmem>>, %arg6: memref<16x128xf32, #tpu.memory_space<vmem>>) attributes {dimension_semantics = [#tpu.dimension_semantics<parallel>, #tpu.dimension_semantics<parallel>, #tpu.dimension_semantics<arbitrary>], iteration_bounds = array<i64: 1, 1, 1>, scalar_prefetch = 0 : i64, scratch_operands = 0 : i64, tpu.core_type = #tpu.core_type<tc>, window_params = [{transform_indices = @transform_0, window_bounds = array<i64: 16, 256>}, {transform_indices = @transform_1, window_bounds = array<i64: 256, 128>}, {transform_indices = @transform_2, window_bounds = array<i64: 1, 128>}, {transform_indices = @transform_3, window_bounds = array<i64: 16, 128>}]} {
    %c0 = arith.constant 0 : index
    %c0_0 = arith.constant 0 : index
    %0 = vector.load %arg3[%c0, %c0_0] : memref<16x256xbf16, #tpu.memory_space<vmem>>, vector<16x256xbf16>
    %c0_1 = arith.constant 0 : index
    %c0_2 = arith.constant 0 : index
    %1 = vector.load %arg4[%c0_1, %c0_2] : memref<256x128xbf16, #tpu.memory_space<vmem>>, vector<256x128xbf16>
    %cst = arith.constant dense<0.000000e+00> : vector<16x128xf32>
    %2 = tpu.matmul %0, %1, %cst {dimension_numbers = #tpu.dot_dimension_numbers<[1], [0], [0], [1], [0, 0, 1, 1], [], []>} : vector<16x256xbf16>, vector<256x128xbf16>, vector<16x128xf32> -> vector<16x128xf32>
    %c0_3 = arith.constant 0 : index
    %c0_4 = arith.constant 0 : index
    %3 = vector.load %arg5[%c0_3, %c0_4] : memref<1x128xf32, #tpu.memory_space<vmem>>, vector<1x128xf32>
    %4 = vector.broadcast %3 : vector<1x128xf32> to vector<16x128xf32>
    %5 = arith.addf %2, %4 : vector<16x128xf32>
    %cst_5 = arith.constant 6.250000e-02 : f32
    %6 = vector.broadcast %cst_5 : f32 to vector<16x128xf32>
    %7 = arith.mulf %5, %6 : vector<16x128xf32>
    %c0_6 = arith.constant 0 : index
    %c0_7 = arith.constant 0 : index
    %8 = vector.load %arg6[%c0_6, %c0_7] : memref<16x128xf32, #tpu.memory_space<vmem>>, vector<16x128xf32>
    tpu.vector_store %arg6[%c0_6, %c0_7], %7 {strides = array<i32>} : memref<16x128xf32, #tpu.memory_space<vmem>>, vector<16x128xf32>,
    return
  }
  func.func @transform_0(%arg0: i32, %arg1: i32, %arg2: i32) -> (i32, i32) {
    %c0_i32 = arith.constant 0 : i32
    return %arg0, %arg2 : i32, i32
  }
  func.func @transform_1(%arg0: i32, %arg1: i32, %arg2: i32) -> (i32, i32) {
    %c0_i32 = arith.constant 0 : i32
    return %arg2, %arg1 : i32, i32
  }
  func.func @transform_2(%arg0: i32, %arg1: i32, %arg2: i32) -> (i32, i32) {
    %c0_i32 = arith.constant 0 : i32
    %c0_i32_0 = arith.constant 0 : i32
    return %c0_i32, %arg1 : i32, i32
  }
  func.func @transform_3(%arg0: i32, %arg1: i32, %arg2: i32) -> (i32, i32) {
    %c0_i32 = arith.constant 0 : i32
    return %arg0, %arg1 : i32, i32
  }
}

</mosaic_0001>

<bundles_post_ra>
// kernel: tpu_custom_call.1
= control target key start
LH: loop header
LB: loop body
LE: loop exit
PB: predicated region body
PF: predicated region fallthrough
CT: control target
= control target key end

     0   :  { %8 = vsyncpa [#allocation3], 0  ;;  %s465_s0 = inlined_call_operand.hbm [shape: bf16[16,256], index: 0, kind: input, shape index: {}]   ;;  %s466_s1 = inlined_call_operand.hbm [shape: bf16[256,128], index: 1, kind: input, shape index: {}]   ;;  %s467_s2 = inlined_call_operand.vmem [shape: f32[1,128], index: 2, kind: input, shape index: {}]   ;;  %s468_s3 = inlined_call_operand.hbm [shape: f32[16,128], index: 3, kind: output, shape index: {}]  }
   0x1   :  { %9 = vsyncpa [#allocation6], 0 }
   0x2   :  { %10 = vsyncpa [#allocation4], 0  ;;  %s393_s12 = smov [#allocation2]   ;;  %s321_s16 = scalar_lea.hbm %s465_s0, 256 }
   0x3   :  { %s16_s13 = sshll.u32 %s393_s12, 4  ;;  %p322_p0 = scmp.ne.s32.totalorder %s465_s0, %s321_s16  ;;  %s17_s13 = int_to_ptr.vmem [resolvable:$true] %s16_s13 }
   0x4   :  { %p325_p1 = scmp.lt.u32.totalorder %s321_s16, %s465_s0 }
   0x6   :  { %p327_p2 = pnand %p325_p1, %p322_p0 }
   0x8   :  { %330 = shalt.err (!%p327_p2)
}
   0x9   :  { %s331_s21 = scalar_lea.vmem %s17_s13, 256  ;;  %p336_p4 = scmp.lt.s32.totalorder %s17_s13, %s17_s13 }
   0xa   :  { %p332_p3 = scmp.ne.s32.totalorder %s17_s13, %s331_s21  ;;  %p337_p5 = scmp.lt.s32.totalorder %s331_s21, %s331_s21 }
   0xc   :  { %p338_p6 = por %p337_p5, %p336_p4 }
   0xe   :  { %p339_p7 = pnand %p338_p6, %p332_p3 }
  0x10   :  { %342 = shalt.err (!%p339_p7)
}
  0x11   :  { %s394_s22 = smov 128   ;;  %s395_s23 = smov 8  }
  0x12   :  { %22 = dma.hbm_to_vmem [thread:$0]  %s465_s0, 256, %s17_s13, [#allocation3], %s394_s22, %s394_s22, %s395_s23  }
  0x13   :  { %s396_s26 = smov [#allocation5]   ;;  %s343_s30 = scalar_lea.hbm %s466_s1, 2048 }
  0x14   :  { %s28_s27 = sshll.u32 %s396_s26, 4  ;;  %p344_p8 = scmp.ne.s32.totalorder %s466_s1, %s343_s30  ;;  %s29_s27 = int_to_ptr.vmem [resolvable:$true] %s28_s27 }
  0x15   :  { %p347_p9 = scmp.lt.u32.totalorder %s343_s30, %s466_s1 }
  0x17   :  { %p349_p10 = pnand %p347_p9, %p344_p8 }
  0x19   :  { %352 = shalt.err (!%p349_p10)
}
  0x1a   :  { %s353_s8 = scalar_lea.vmem %s29_s27, 2048  ;;  %p358_p12 = scmp.lt.s32.totalorder %s29_s27, %s29_s27 }
  0x1b   :  { %p354_p11 = scmp.ne.s32.totalorder %s29_s27, %s353_s8  ;;  %p359_p13 = scmp.lt.s32.totalorder %s353_s8, %s353_s8 }
  0x1d   :  { %p360_p0 = por %p359_p13, %p358_p12 }
  0x1f   :  { %p361_p1 = pnand %p360_p0, %p354_p11 }
  0x21   :  { %364 = shalt.err (!%p361_p1)
}
  0x22   :  { %s397_s0 = smov 64   ;;  %s398_s9 = smov 4  }
  0x23   :  { %34 = dma.hbm_to_vmem [thread:$0]  %s466_s1, 2048, %s29_s27, [#allocation6], %s397_s0, %s397_s0, %s398_s9  }
  0x24   :  { %387 = dma.done.wait [#allocation3], 256  }
  0x25   :  { %388 = vsyncadd [#allocation3], 4294967040 }
  0x26   :  { %389 = dma.done.wait [#allocation6], 2048  }
  0x27   :  { %390 = vsyncadd [#allocation6], 4294965248  ;;  %v302_v0 = vld [vmem:[#allocation5 + $0x40] sm:$0xff]   ;;  %v304_v2 = vld [vmem:[#allocation5 + $0x48] sm:$0xff]   ;;  %s399_s13 = smov [#allocation7]  }
  0x28   :  { %v303_v1 = vld [vmem:[#allocation5] sm:$0xff]   ;;  %273 = vmatprep.subr.bf16.mxu0 %v302_v0  ;;  %v305_v3 = vld [vmem:[#allocation5 + $0x8] sm:$0xff]   ;;  %v306_v4 = vld [vmem:[#allocation5 + $0x50] sm:$0xff]   ;;  %s241_s14 = sshll.u32 %s399_s13, 4  ;;  %s242_s14 = int_to_ptr.vmem [resolvable:$true] %s241_s14 }
  0x29   :  { %274 = vmatpush3.bf16.msra.mxu0 %v303_v1  ;;  %v307_v5 = vld [vmem:[#allocation5 + $0x10] sm:$0xff]   ;;  %v308_v6 = vld [vmem:[#allocation5 + $0x58] sm:$0xff]   ;;  %v310_v8 = vld [vmem:[#allocation5 + $0x60] sm:$0xff]   ;;  %s365_s15 = scalar_lea.vmem %s242_s14, 256  ;;  %p370_p3 = scmp.lt.s32.totalorder %s242_s14, %s242_s14 }
  0x2a   :  { %275 = vmatprep.subr.bf16.mxu0 %v304_v2  ;;  %v309_v7 = vld [vmem:[#allocation5 + $0x18] sm:$0xff]   ;;  %v311_v9 = vld [vmem:[#allocation5 + $0x20] sm:$0xff]   ;;  %v312_v10 = vld [vmem:[#allocation5 + $0x68] sm:$0xff]   ;;  %p366_p2 = scmp.ne.s32.totalorder %s242_s14, %s365_s15  ;;  %p371_p4 = scmp.lt.s32.totalorder %s365_s15, %s365_s15 }
  0x2b   :  { %v320_v11 = vld [vmem:[#allocation2 + $0x4] ss:$8 sps:$4 sm:$0xff]   ;;  %v313_v12 = vld [vmem:[#allocation5 + $0x28] sm:$0xff]   ;;  %v318_v17 = vld [vmem:[#allocation2] ss:$8 sps:$4 sm:$0xff]  }
  0x2c   :  { %223 = vmatprep.mubr.bf16.mxu0 %v320_v11  ;;  %v314_v13 = vld [vmem:[#allocation5 + $0x70] sm:$0xff]   ;;  %v316_v15 = vld [vmem:[#allocation5 + $0x78] sm:$0xff]   ;;  %p372_p5 = por %p371_p4, %p370_p3 }
  0x2d   :  { %276 = vmatpush3.bf16.msra.mxu0 %v305_v3  ;;  %v315_v14 = vld [vmem:[#allocation5 + $0x30] sm:$0xff]   ;;  %v317_v16 = vld [vmem:[#allocation5 + $0x38] sm:$0xff]  }
  0x2e   :  { %277 = vmatprep.subr.bf16.mxu0 %v306_v4  ;;  %v254_v19 = vld [vmem:[%s467_s2] ss:$0 sm:$0xff]  ;;  %p373_p6 = pnand %p372_p5, %p366_p2 }
  0x31   :  { %278 = vmatpush3.bf16.msra.mxu0 %v307_v5 }
  0x32   :  { %279 = vmatprep.subr.bf16.mxu0 %v308_v6 }
  0x35   :  { %280 = vmatpush3.bf16.msra.mxu0 %v309_v7 }
  0x36   :  { %281 = vmatprep.subr.bf16.mxu0 %v310_v8 }
  0x39   :  { %282 = vmatpush3.bf16.msra.mxu0 %v311_v9 }
  0x3a   :  { %283 = vmatprep.subr.bf16.mxu0 %v312_v10 }
  0x3d   :  { %284 = vmatpush3.bf16.msra.mxu0 %v313_v12 }
  0x3e   :  { %285 = vmatprep.subr.bf16.mxu0 %v314_v13 }
  0x41   :  { %286 = vmatpush3.bf16.msra.mxu0 %v315_v14 }
  0x42   :  { %287 = vmatprep.subr.bf16.mxu0 %v316_v15 }
  0x45   :  { %288 = vmatpush3.bf16.msra.mxu0 %v317_v16 }
  0x48   :  { %224 = vmatmul.mubr.bf16.vlgmr.msra.gmra.mrb[0].mxu0 %v318_v17 }
 0x11b   :  { %v289_v18 = vpop.f32.mrb[0].mxu0 }
 0x11c   :  { %v290_v20 = vpop.f32.mrb[1].mxu0 }
 0x11d   :  { %v291_v21 = vadd.f32 %v290_v20, %v289_v18  ;;  %v292_v22 = vpop.f32.mrb[2].mxu0 }
 0x11e   :  { %v293_v23 = vpop.f32.mrb[3].mxu0 }
 0x11f   :  { %v226_v24 = vadd.f32 %v291_v21, %v254_v19  ;;  %v294_v25 = vadd.f32 %v293_v23, %v292_v22 }
 0x121   :  { %v232_v26 = vmul.f32 0.0625, %v226_v24  ;;  %v229_v27 = vadd.f32 %v294_v25, %v254_v19 }
 0x123   :  { %234 = vst [vmem:[#allocation7] sm:$0xff] %v232_v26  ;;  %v233_v28 = vmul.f32 0.0625, %v229_v27 }
 0x125   :  { %235 = vst [vmem:[#allocation7 + $0x8] sm:$0xff] %v233_v28 }
 0x126   :  { %376 = shalt.err (!%p373_p6)
}
 0x127   :  { %s377_s17 = scalar_lea.hbm %s468_s3, 256 }
 0x128   :  { %p378_p7 = scmp.ne.s32.totalorder %s468_s3, %s377_s17  ;;  %p381_p8 = scmp.lt.u32.totalorder %s377_s17, %s468_s3 }
 0x12a   :  { %p383_p9 = pnand %p381_p8, %p378_p7 }
 0x12c   :  { %386 = shalt.err (!%p383_p9)
}
 0x12d   :  { %247 = dma.vmem_to_hbm [thread:$0]  %s242_s14, 256, %s468_s3, [#allocation4], %s394_s22, %s394_s22, %s395_s23  }
 0x12e   :  { %391 = dma.done.wait [#allocation4], 256  }
 0x12f   :  { %392 = vsyncadd [#allocation4], 4294967040 }
 0x130   :  { %251 = vsyncpa [#allocation3], 1 }
 0x131   :  { %252 = vsyncpa [#allocation6], 1 }
 0x132   :  { %253 = vsyncpa [#allocation4], 1 }

</bundles_post_ra>
